<compile_context>
chip_gen: v5e
topology: v5e:2x2
jax: 0.10.0
libtpu: 0.0.40
codegen_flags: <defaults>
</compile_context>

<pallas_src>
import math
from functools import partial

import jax
import jax.numpy as jnp
import numpy as np
from jax.experimental import pallas as pl
from jax.experimental.pallas import tpu as pltpu


# ----------------------------- kernel -----------------------------
def mha_kernel(q_ref, k_ref, v_ref, mask_ref, wqkv_ref, bqkv_ref, wo_ref, bo_ref,
               x_ref, attn_ref, ctx_ref, *, n_heads):
    """One batch element per grid step."""
    sq, hid = q_ref.shape
    hd = hid // n_heads
    scale = 1.0 / math.sqrt(hd)

    # fc_q / fc_k / fc_v: three lane-dense [S,H] @ [H,H] MXU matmuls (N = H),
    # biases added on the VPU.  No per-head weight layout, no activation broadcast.
    q = jnp.dot(q_ref[...], wqkv_ref[0], preferred_element_type=jnp.float32) + bqkv_ref[0]
    k = jnp.dot(k_ref[...], wqkv_ref[1], preferred_element_type=jnp.float32) + bqkv_ref[1]
    v = jnp.dot(v_ref[...], wqkv_ref[2], preferred_element_type=jnp.float32) + bqkv_ref[2]

    valid = mask_ref[...] != 0.0          # [1 or Sq, Sk]; broadcasts over query rows

    # Scaled dot-product attention.  Static unroll over heads: each head is an
    # independent [Sq,Sk] MXU pass whether written as a batched einsum or a loop,
    # so this adds no MXU pushes and avoids in-kernel [S,NH,hd] relayouts.
    for n in range(n_heads):
        lo = n * hd
        qn = q[:, lo:lo + hd]             # PyTorch head split: columns are head-major
        kn = k[:, lo:lo + hd]
        vn = v[:, lo:lo + hd]

        energy = jnp.dot(qn, kn.T, preferred_element_type=jnp.float32) * scale  # [Sq,Sk]
        energy = jnp.where(valid, energy, -1e10)

        # Exact softmax: the attention map is a user-visible output, so no
        # approximate reciprocal (rows sum to 1 up to f32 rounding).
        m = jnp.max(energy, axis=-1, keepdims=True)
        p = jnp.exp(energy - m)
        attn = p / jnp.sum(p, axis=-1, keepdims=True)
        attn_ref[n] = attn                # final [B,NH,Sq,Sk] layout, no post-kernel gather

        # dropout(attention) == identity in eval mode.
        # TODO(synk): training-mode dropout (RNG + scaling) is not implemented.
        ctx_ref[:, lo:lo + hd] = jnp.dot(attn, vn, preferred_element_type=jnp.float32)

    # fc_o: heads already merged in the ctx scratch -> ONE [Sq,H] @ [H,H] matmul
    # with K = NH*hd = H (head reduction folded into the MXU contraction).
    x_ref[...] = (jnp.dot(ctx_ref[...], wo_ref[...], preferred_element_type=jnp.float32)
                  + bo_ref[...])


# ----------------------------- wrapper -----------------------------
def pack_params(params):
    """Init-time weight repack (hoisted out of the hot path; pure layout glue)."""
    return {
        "wqkv": jnp.stack([params["wq"], params["wk"], params["wv"]], axis=0),              # [3,H,H]
        "bqkv": jnp.stack([params["bq"], params["bk"], params["bv"]], axis=0)[:, None, :],  # [3,1,H]
        "wo": params["wo"],                                                                 # [H,H]
        "bo": params["bo"][None, :],                                                        # [1,H]
    }


@partial(jax.jit, static_argnames=("n_heads",))
def multi_head_attention(query, key, value, mask, packed, *, n_heads):
    """Pallas forward of MultiHeadAttentionLayer.  Returns (x, attention)."""
    b, sq, hid = query.shape
    bk, sk, _ = key.shape
    assert value.shape == key.shape and bk == b and hid % n_heads == 0
    nh = n_heads

    # Mask -> small per-batch boolean slab (no O((B*S)^2) bias, no batch flattening).
    # Supports masks broadcastable over the head dim (e.g. key-padding [B,1,1,Sk]
    # or [.,.,Sq,Sk]).  TODO(synk): per-head masks (non-1 head dim) are unsupported.
    if mask is None:
        mq = 1
        mask_arr = jnp.ones((b, 1, sk), dtype=jnp.float32)
    else:
        m = jnp.asarray(mask)
        mq = sq if (m.ndim >= 2 and m.shape[-2] == sq) else 1
        mask_arr = (jnp.broadcast_to(m != 0, (b, 1, mq, sk))
                    .reshape(b, mq, sk).astype(jnp.float32))

    kernel = partial(mha_kernel, n_heads=nh)
    x, attn = pl.pallas_call(
        kernel,
        grid=(b,),
        in_specs=[
            pl.BlockSpec((None, sq, hid), lambda i: (i, 0, 0)),         # query
            pl.BlockSpec((None, sk, hid), lambda i: (i, 0, 0)),         # key
            pl.BlockSpec((None, sk, hid), lambda i: (i, 0, 0)),         # value
            pl.BlockSpec((None, mq, sk), lambda i: (i, 0, 0)),          # mask slab
            pl.BlockSpec((3, hid, hid), lambda i: (0, 0, 0)),           # wq|wk|wv
            pl.BlockSpec((3, 1, hid), lambda i: (0, 0, 0)),             # bq|bk|bv
            pl.BlockSpec((hid, hid), lambda i: (0, 0)),                 # wo
            pl.BlockSpec((1, hid), lambda i: (0, 0)),                   # bo
        ],
        out_specs=(
            pl.BlockSpec((None, sq, hid), lambda i: (i, 0, 0)),         # x
            pl.BlockSpec((None, nh, sq, sk), lambda i: (i, 0, 0, 0)),   # attention
        ),
        out_shape=(
            jax.ShapeDtypeStruct((b, sq, hid), jnp.float32),
            jax.ShapeDtypeStruct((b, nh, sq, sk), jnp.float32),
        ),
        scratch_shapes=[pltpu.VMEM((sq, hid), jnp.float32)],            # merged-head context
        compiler_params=pltpu.CompilerParams(
            dimension_semantics=("parallel",)),                         # 2nd TC on v7x
    )(query, key, value, mask_arr,
      packed["wqkv"], packed["bqkv"], packed["wo"], packed["bo"])
    return x, attn


# ----------------------------- pure-JAX reference -----------------------------
def reference_mha(query, key, value, mask, params, n_heads):
    b, sq, hid = query.shape
    sk = key.shape[1]
    hd = hid // n_heads
    q = query @ params["wq"] + params["bq"]
    k = key @ params["wk"] + params["bk"]
    v = value @ params["wv"] + params["bv"]

    def split(t, s):
        return t.reshape(b, s, n_heads, hd).transpose(0, 2, 1, 3)

    qh, kh, vh = split(q, sq), split(k, sk), split(v, sk)
    energy = jnp.einsum("bhqd,bhkd->bhqk", qh, kh) / math.sqrt(hd)
    if mask is not None:
        energy = jnp.where(mask == 0, -1e10, energy)
    attention = jax.nn.softmax(energy, axis=-1)
    xh = jnp.einsum("bhqk,bhkd->bhqd", attention, vh)
    x = xh.transpose(0, 2, 1, 3).reshape(b, sq, hid)
    x = x @ params["wo"] + params["bo"]
    return x, attention


# ----------------------------- deterministic params -----------------------------
def init_params(rng, hid):
    ks = jax.random.split(rng, 8)

    def w(k, shape, s):
        return s * jax.random.normal(k, shape, dtype=jnp.float32)

    return {
        "wq": w(ks[0], (hid, hid), 0.25), "bq": w(ks[1], (hid,), 0.1),
        "wk": w(ks[2], (hid, hid), 0.25), "bk": w(ks[3], (hid,), 0.1),
        "wv": w(ks[4], (hid, hid), 0.25), "bv": w(ks[5], (hid,), 0.1),
        "wo": w(ks[6], (hid, hid), 0.25), "bo": w(ks[7], (hid,), 0.1),
    }


# ----------------------------- main -----------------------------
if __name__ == "__main__":
    B, S, H, NH = 2, 8, 32, 4
    root = jax.random.PRNGKey(0)
    kp, kq, kk, kv = jax.random.split(root, 4)
    params = init_params(kp, H)
    packed = pack_params(params)   # hoisted: packed once at init, not per call

    query = jax.random.normal(kq, (B, S, H), dtype=jnp.float32)
    key = jax.random.normal(kk, (B, S, H), dtype=jnp.float32)
    value = jax.random.normal(kv, (B, S, H), dtype=jnp.float32)
    # Encoder-style key-padding mask [B, 1, 1, S]; batch 1 has its last 3 keys padded.
    mask = jnp.ones((B, 1, 1, S), dtype=jnp.float32).at[1, :, :, 5:].set(0.0)

    x, attn = multi_head_attention(query, key, value, mask, packed, n_heads=NH)
    x = jax.block_until_ready(x)
    attn = jax.block_until_ready(attn)

    x_ref, attn_ref = reference_mha(query, key, value, mask, params, NH)
    assert x.shape == (B, S, H) and attn.shape == (B, NH, S, S)

    # Softmax is exact now: attention rows sum to 1 up to f32 rounding.
    np.testing.assert_allclose(np.asarray(attn).sum(-1), 1.0, atol=1e-5)
    # Remaining tolerance covers possible differences in the f32 (multi-pass bf16)
    # MXU matmul algorithms between the Mosaic kernel and the XLA reference,
    # not any softmax approximation.
    np.testing.assert_allclose(np.asarray(x), np.asarray(x_ref), atol=1e-2, rtol=1e-2)
    np.testing.assert_allclose(np.asarray(attn), np.asarray(attn_ref), atol=1e-2, rtol=1e-2)
    print("KERNEL_OK")
</pallas_src>

<mosaic_0001>
module attributes {stable_mosaic.version = 11 : i64} {
  func.func @mha_kernel(%arg0: i32, %arg1: memref<1x8x32xf32, #tpu.memory_space<vmem>>, %arg2: memref<1x8x32xf32, #tpu.memory_space<vmem>>, %arg3: memref<1x8x32xf32, #tpu.memory_space<vmem>>, %arg4: memref<1x1x8xf32, #tpu.memory_space<vmem>>, %arg5: memref<3x32x32xf32, #tpu.memory_space<vmem>>, %arg6: memref<3x1x32xf32, #tpu.memory_space<vmem>>, %arg7: memref<32x32xf32, #tpu.memory_space<vmem>>, %arg8: memref<1x32xf32, #tpu.memory_space<vmem>>, %arg9: memref<1x8x32xf32, #tpu.memory_space<vmem>>, %arg10: memref<1x4x8x8xf32, #tpu.memory_space<vmem>>, %arg11: memref<8x32xf32, #tpu.memory_space<vmem>>) attributes {dimension_semantics = [#tpu.dimension_semantics<parallel>], iteration_bounds = array<i64: 2>, scalar_prefetch = 0 : i64, scratch_operands = 1 : i64, tpu.core_type = #tpu.core_type<tc>, window_params = [{transform_indices = @transform_0, window_bounds = array<i64: 1, 8, 32>}, {transform_indices = @transform_1, window_bounds = array<i64: 1, 8, 32>}, {transform_indices = @transform_2, window_bounds = array<i64: 1, 8, 32>}, {transform_indices = @transform_3, window_bounds = array<i64: 1, 1, 8>}, {pipeline_mode = #tpu.pipeline_mode<synchronous>, transform_indices = @transform_4, window_bounds = array<i64: 3, 32, 32>}, {pipeline_mode = #tpu.pipeline_mode<synchronous>, transform_indices = @transform_5, window_bounds = array<i64: 3, 1, 32>}, {pipeline_mode = #tpu.pipeline_mode<synchronous>, transform_indices = @transform_6, window_bounds = array<i64: 32, 32>}, {pipeline_mode = #tpu.pipeline_mode<synchronous>, transform_indices = @transform_7, window_bounds = array<i64: 1, 32>}, {transform_indices = @transform_8, window_bounds = array<i64: 1, 8, 32>}, {transform_indices = @transform_9, window_bounds = array<i64: 1, 4, 8, 8>}]} {
    %c0 = arith.constant 0 : index
    %c0_0 = arith.constant 0 : index
    %c0_1 = arith.constant 0 : index
    %0 = vector.load %arg1[%c0, %c0_0, %c0_1] : memref<1x8x32xf32, #tpu.memory_space<vmem>>, vector<1x8x32xf32>
    %1 = vector.shape_cast %0 : vector<1x8x32xf32> to vector<8x32xf32>
    %c0_2 = arith.constant 0 : index
    %c0_3 = arith.constant 0 : index
    %c0_4 = arith.constant 0 : index
    %2 = vector.load %arg5[%c0_2, %c0_3, %c0_4] : memref<3x32x32xf32, #tpu.memory_space<vmem>>, vector<1x32x32xf32>
    %3 = vector.shape_cast %2 : vector<1x32x32xf32> to vector<32x32xf32>
    %cst = arith.constant dense<0.000000e+00> : vector<8x32xf32>
    %4 = tpu.matmul %1, %3, %cst {dimension_numbers = #tpu.dot_dimension_numbers<[1], [0], [0], [1], [0, 0, 1, 1], [], []>} : vector<8x32xf32>, vector<32x32xf32>, vector<8x32xf32> -> vector<8x32xf32>
    %c0_5 = arith.constant 0 : index
    %c0_6 = arith.constant 0 : index
    %c0_7 = arith.constant 0 : index
    %5 = vector.load %arg6[%c0_5, %c0_6, %c0_7] : memref<3x1x32xf32, #tpu.memory_space<vmem>>, vector<1x1x32xf32>
    %6 = vector.shape_cast %5 : vector<1x1x32xf32> to vector<1x32xf32>
    %7 = vector.broadcast %6 : vector<1x32xf32> to vector<8x32xf32>
    %8 = arith.addf %4, %7 : vector<8x32xf32>
    %c0_8 = arith.constant 0 : index
    %c0_9 = arith.constant 0 : index
    %c0_10 = arith.constant 0 : index
    %9 = vector.load %arg2[%c0_8, %c0_9, %c0_10] : memref<1x8x32xf32, #tpu.memory_space<vmem>>, vector<1x8x32xf32>
    %10 = vector.shape_cast %9 : vector<1x8x32xf32> to vector<8x32xf32>
    %c1 = arith.constant 1 : index
    %c0_11 = arith.constant 0 : index
    %c0_12 = arith.constant 0 : index
    %11 = vector.load %arg5[%c1, %c0_11, %c0_12] : memref<3x32x32xf32, #tpu.memory_space<vmem>>, vector<1x32x32xf32>
    %12 = vector.shape_cast %11 : vector<1x32x32xf32> to vector<32x32xf32>
    %cst_13 = arith.constant dense<0.000000e+00> : vector<8x32xf32>
    %13 = tpu.matmul %10, %12, %cst_13 {dimension_numbers = #tpu.dot_dimension_numbers<[1], [0], [0], [1], [0, 0, 1, 1], [], []>} : vector<8x32xf32>, vector<32x32xf32>, vector<8x32xf32> -> vector<8x32xf32>
    %c1_14 = arith.constant 1 : index
    %c0_15 = arith.constant 0 : index
    %c0_16 = arith.constant 0 : index
    %14 = vector.load %arg6[%c1_14, %c0_15, %c0_16] : memref<3x1x32xf32, #tpu.memory_space<vmem>>, vector<1x1x32xf32>
    %15 = vector.shape_cast %14 : vector<1x1x32xf32> to vector<1x32xf32>
    %16 = vector.broadcast %15 : vector<1x32xf32> to vector<8x32xf32>
    %17 = arith.addf %13, %16 : vector<8x32xf32>
    %c0_17 = arith.constant 0 : index
    %c0_18 = arith.constant 0 : index
    %c0_19 = arith.constant 0 : index
    %18 = vector.load %arg3[%c0_17, %c0_18, %c0_19] : memref<1x8x32xf32, #tpu.memory_space<vmem>>, vector<1x8x32xf32>
    %19 = vector.shape_cast %18 : vector<1x8x32xf32> to vector<8x32xf32>
    %c2 = arith.constant 2 : index
    %c0_20 = arith.constant 0 : index
    %c0_21 = arith.constant 0 : index
    %20 = vector.load %arg5[%c2, %c0_20, %c0_21] : memref<3x32x32xf32, #tpu.memory_space<vmem>>, vector<1x32x32xf32>
    %21 = vector.shape_cast %20 : vector<1x32x32xf32> to vector<32x32xf32>
    %cst_22 = arith.constant dense<0.000000e+00> : vector<8x32xf32>
    %22 = tpu.matmul %19, %21, %cst_22 {dimension_numbers = #tpu.dot_dimension_numbers<[1], [0], [0], [1], [0, 0, 1, 1], [], []>} : vector<8x32xf32>, vector<32x32xf32>, vector<8x32xf32> -> vector<8x32xf32>
    %c2_23 = arith.constant 2 : index
    %c0_24 = arith.constant 0 : index
    %c0_25 = arith.constant 0 : index
    %23 = vector.load %arg6[%c2_23, %c0_24, %c0_25] : memref<3x1x32xf32, #tpu.memory_space<vmem>>, vector<1x1x32xf32>
    %24 = vector.shape_cast %23 : vector<1x1x32xf32> to vector<1x32xf32>
    %25 = vector.broadcast %24 : vector<1x32xf32> to vector<8x32xf32>
    %26 = arith.addf %22, %25 : vector<8x32xf32>
    %c0_26 = arith.constant 0 : index
    %c0_27 = arith.constant 0 : index
    %c0_28 = arith.constant 0 : index
    %27 = vector.load %arg4[%c0_26, %c0_27, %c0_28] : memref<1x1x8xf32, #tpu.memory_space<vmem>>, vector<1x1x8xf32>
    %28 = vector.shape_cast %27 : vector<1x1x8xf32> to vector<1x8xf32>
    %cst_29 = arith.constant 0.000000e+00 : f32
    %29 = vector.broadcast %cst_29 : f32 to vector<1x8xf32>
    %30 = arith.cmpf one, %28, %29 : vector<1x8xf32>
    %31 = vector.extract_strided_slice %8 {offsets = [0, 0], sizes = [8, 8], strides = [1, 1]} : vector<8x32xf32> to vector<8x8xf32>
    %32 = vector.extract_strided_slice %17 {offsets = [0, 0], sizes = [8, 8], strides = [1, 1]} : vector<8x32xf32> to vector<8x8xf32>
    %33 = vector.extract_strided_slice %26 {offsets = [0, 0], sizes = [8, 8], strides = [1, 1]} : vector<8x32xf32> to vector<8x8xf32>
    %34 = tpu.transpose %32, [1, 0] : vector<8x8xf32> -> vector<8x8xf32>
    %cst_30 = arith.constant dense<0.000000e+00> : vector<8x8xf32>
    %35 = tpu.matmul %31, %34, %cst_30 {dimension_numbers = #tpu.dot_dimension_numbers<[1], [0], [0], [1], [0, 0, 1, 1], [], []>} : vector<8x8xf32>, vector<8x8xf32>, vector<8x8xf32> -> vector<8x8xf32>
    %cst_31 = arith.constant 0.353553385 : f32
    %36 = vector.broadcast %cst_31 : f32 to vector<8x8xf32>
    %37 = arith.mulf %35, %36 : vector<8x8xf32>
    %cst_32 = arith.constant -1.000000e+10 : f32
    %38 = vector.shape_cast %30 : vector<1x8xi1> to vector<1x8xi1>
    %39 = vector.broadcast %38 : vector<1x8xi1> to vector<8x8xi1>
    %40 = vector.broadcast %cst_32 : f32 to vector<8x8xf32>
    %41 = arith.select %39, %37, %40 : vector<8x8xi1>, vector<8x8xf32>
    %cst_33 = arith.constant dense<0xFF800000> : vector<8xf32>
    %42 = vector.multi_reduction <maximumf>, %41, %cst_33 [1] : vector<8x8xf32> to vector<8xf32>
    %43 = vector.shape_cast %42 : vector<8xf32> to vector<8x1xf32>
    %44 = vector.broadcast %43 : vector<8x1xf32> to vector<8x8xf32>
    %45 = arith.subf %41, %44 : vector<8x8xf32>
    %46 = math.exp %45 : vector<8x8xf32>
    %cst_34 = arith.constant dense<0.000000e+00> : vector<8xf32>
    %47 = vector.multi_reduction <add>, %46, %cst_34 [1] : vector<8x8xf32> to vector<8xf32>
    %48 = vector.shape_cast %47 : vector<8xf32> to vector<8x1xf32>
    %49 = vector.broadcast %48 : vector<8x1xf32> to vector<8x8xf32>
    %50 = arith.divf %46, %49 : vector<8x8xf32>
    %c0_35 = arith.constant 0 : index
    %c0_36 = arith.constant 0 : index
    %c0_37 = arith.constant 0 : index
    %c0_38 = arith.constant 0 : index
    %51 = vector.load %arg10[%c0_35, %c0_36, %c0_37, %c0_38] : memref<1x4x8x8xf32, #tpu.memory_space<vmem>>, vector<1x1x8x8xf32>
    %52 = vector.shape_cast %51 : vector<1x1x8x8xf32> to vector<8x8xf32>
    %53 = vector.shape_cast %50 : vector<8x8xf32> to vector<1x1x8x8xf32>
    tpu.vector_store %arg10[%c0_35, %c0_36, %c0_37, %c0_38], %53 {strides = array<i32>} : memref<1x4x8x8xf32, #tpu.memory_space<vmem>>, vector<1x1x8x8xf32>,
    %cst_39 = arith.constant dense<0.000000e+00> : vector<8x8xf32>
    %54 = tpu.matmul %50, %33, %cst_39 {dimension_numbers = #tpu.dot_dimension_numbers<[1], [0], [0], [1], [0, 0, 1, 1], [], []>} : vector<8x8xf32>, vector<8x8xf32>, vector<8x8xf32> -> vector<8x8xf32>
    %c0_40 = arith.constant 0 : index
    %c0_41 = arith.constant 0 : index
    %55 = vector.load %arg11[%c0_40, %c0_41] : memref<8x32xf32, #tpu.memory_space<vmem>>, vector<8x8xf32>
    tpu.vector_store %arg11[%c0_40, %c0_41], %54 {strides = array<i32>} : memref<8x32xf32, #tpu.memory_space<vmem>>, vector<8x8xf32>,
    %56 = vector.extract_strided_slice %8 {offsets = [0, 8], sizes = [8, 8], strides = [1, 1]} : vector<8x32xf32> to vector<8x8xf32>
    %57 = vector.extract_strided_slice %17 {offsets = [0, 8], sizes = [8, 8], strides = [1, 1]} : vector<8x32xf32> to vector<8x8xf32>
    %58 = vector.extract_strided_slice %26 {offsets = [0, 8], sizes = [8, 8], strides = [1, 1]} : vector<8x32xf32> to vector<8x8xf32>
    %59 = tpu.transpose %57, [1, 0] : vector<8x8xf32> -> vector<8x8xf32>
    %cst_42 = arith.constant dense<0.000000e+00> : vector<8x8xf32>
    %60 = tpu.matmul %56, %59, %cst_42 {dimension_numbers = #tpu.dot_dimension_numbers<[1], [0], [0], [1], [0, 0, 1, 1], [], []>} : vector<8x8xf32>, vector<8x8xf32>, vector<8x8xf32> -> vector<8x8xf32>
    %cst_43 = arith.constant 0.353553385 : f32
    %61 = vector.broadcast %cst_43 : f32 to vector<8x8xf32>
    %62 = arith.mulf %60, %61 : vector<8x8xf32>
    %cst_44 = arith.constant -1.000000e+10 : f32
    %63 = vector.shape_cast %30 : vector<1x8xi1> to vector<1x8xi1>
    %64 = vector.broadcast %63 : vector<1x8xi1> to vector<8x8xi1>
    %65 = vector.broadcast %cst_44 : f32 to vector<8x8xf32>
    %66 = arith.select %64, %62, %65 : vector<8x8xi1>, vector<8x8xf32>
    %cst_45 = arith.constant dense<0xFF800000> : vector<8xf32>
    %67 = vector.multi_reduction <maximumf>, %66, %cst_45 [1] : vector<8x8xf32> to vector<8xf32>
    %68 = vector.shape_cast %67 : vector<8xf32> to vector<8x1xf32>
    %69 = vector.broadcast %68 : vector<8x1xf32> to vector<8x8xf32>
    %70 = arith.subf %66, %69 : vector<8x8xf32>
    %71 = math.exp %70 : vector<8x8xf32>
    %cst_46 = arith.constant dense<0.000000e+00> : vector<8xf32>
    %72 = vector.multi_reduction <add>, %71, %cst_46 [1] : vector<8x8xf32> to vector<8xf32>
    %73 = vector.shape_cast %72 : vector<8xf32> to vector<8x1xf32>
    %74 = vector.broadcast %73 : vector<8x1xf32> to vector<8x8xf32>
    %75 = arith.divf %71, %74 : vector<8x8xf32>
    %c0_47 = arith.constant 0 : index
    %c1_48 = arith.constant 1 : index
    %c0_49 = arith.constant 0 : index
    %c0_50 = arith.constant 0 : index
    %76 = vector.load %arg10[%c0_47, %c1_48, %c0_49, %c0_50] : memref<1x4x8x8xf32, #tpu.memory_space<vmem>>, vector<1x1x8x8xf32>
    %77 = vector.shape_cast %76 : vector<1x1x8x8xf32> to vector<8x8xf32>
    %78 = vector.shape_cast %75 : vector<8x8xf32> to vector<1x1x8x8xf32>
    tpu.vector_store %arg10[%c0_47, %c1_48, %c0_49, %c0_50], %78 {strides = array<i32>} : memref<1x4x8x8xf32, #tpu.memory_space<vmem>>, vector<1x1x8x8xf32>,
    %cst_51 = arith.constant dense<0.000000e+00> : vector<8x8xf32>
    %79 = tpu.matmul %75, %58, %cst_51 {dimension_numbers = #tpu.dot_dimension_numbers<[1], [0], [0], [1], [0, 0, 1, 1], [], []>} : vector<8x8xf32>, vector<8x8xf32>, vector<8x8xf32> -> vector<8x8xf32>
    %c0_52 = arith.constant 0 : index
    %c8 = arith.constant 8 : index
    %80 = vector.load %arg11[%c0_52, %c8] : memref<8x32xf32, #tpu.memory_space<vmem>>, vector<8x8xf32>
    tpu.vector_store %arg11[%c0_52, %c8], %79 {strides = array<i32>} : memref<8x32xf32, #tpu.memory_space<vmem>>, vector<8x8xf32>,
    %81 = vector.extract_strided_slice %8 {offsets = [0, 16], sizes = [8, 8], strides = [1, 1]} : vector<8x32xf32> to vector<8x8xf32>
    %82 = vector.extract_strided_slice %17 {offsets = [0, 16], sizes = [8, 8], strides = [1, 1]} : vector<8x32xf32> to vector<8x8xf32>
    %83 = vector.extract_strided_slice %26 {offsets = [0, 16], sizes = [8, 8], strides = [1, 1]} : vector<8x32xf32> to vector<8x8xf32>
    %84 = tpu.transpose %82, [1, 0] : vector<8x8xf32> -> vector<8x8xf32>
    %cst_53 = arith.constant dense<0.000000e+00> : vector<8x8xf32>
    %85 = tpu.matmul %81, %84, %cst_53 {dimension_numbers = #tpu.dot_dimension_numbers<[1], [0], [0], [1], [0, 0, 1, 1], [], []>} : vector<8x8xf32>, vector<8x8xf32>, vector<8x8xf32> -> vector<8x8xf32>
    %cst_54 = arith.constant 0.353553385 : f32
    %86 = vector.broadcast %cst_54 : f32 to vector<8x8xf32>
    %87 = arith.mulf %85, %86 : vector<8x8xf32>
    %cst_55 = arith.constant -1.000000e+10 : f32
    %88 = vector.shape_cast %30 : vector<1x8xi1> to vector<1x8xi1>
    %89 = vector.broadcast %88 : vector<1x8xi1> to vector<8x8xi1>
    %90 = vector.broadcast %cst_55 : f32 to vector<8x8xf32>
    %91 = arith.select %89, %87, %90 : vector<8x8xi1>, vector<8x8xf32>
    %cst_56 = arith.constant dense<0xFF800000> : vector<8xf32>
    %92 = vector.multi_reduction <maximumf>, %91, %cst_56 [1] : vector<8x8xf32> to vector<8xf32>
    %93 = vector.shape_cast %92 : vector<8xf32> to vector<8x1xf32>
    %94 = vector.broadcast %93 : vector<8x1xf32> to vector<8x8xf32>
    %95 = arith.subf %91, %94 : vector<8x8xf32>
    %96 = math.exp %95 : vector<8x8xf32>
    %cst_57 = arith.constant dense<0.000000e+00> : vector<8xf32>
    %97 = vector.multi_reduction <add>, %96, %cst_57 [1] : vector<8x8xf32> to vector<8xf32>
    %98 = vector.shape_cast %97 : vector<8xf32> to vector<8x1xf32>
    %99 = vector.broadcast %98 : vector<8x1xf32> to vector<8x8xf32>
    %100 = arith.divf %96, %99 : vector<8x8xf32>
    %c0_58 = arith.constant 0 : index
    %c2_59 = arith.constant 2 : index
    %c0_60 = arith.constant 0 : index
    %c0_61 = arith.constant 0 : index
    %101 = vector.load %arg10[%c0_58, %c2_59, %c0_60, %c0_61] : memref<1x4x8x8xf32, #tpu.memory_space<vmem>>, vector<1x1x8x8xf32>
    %102 = vector.shape_cast %101 : vector<1x1x8x8xf32> to vector<8x8xf32>
    %103 = vector.shape_cast %100 : vector<8x8xf32> to vector<1x1x8x8xf32>
    tpu.vector_store %arg10[%c0_58, %c2_59, %c0_60, %c0_61], %103 {strides = array<i32>} : memref<1x4x8x8xf32, #tpu.memory_space<vmem>>, vector<1x1x8x8xf32>,
    %cst_62 = arith.constant dense<0.000000e+00> : vector<8x8xf32>
    %104 = tpu.matmul %100, %83, %cst_62 {dimension_numbers = #tpu.dot_dimension_numbers<[1], [0], [0], [1], [0, 0, 1, 1], [], []>} : vector<8x8xf32>, vector<8x8xf32>, vector<8x8xf32> -> vector<8x8xf32>
    %c0_63 = arith.constant 0 : index
    %c16 = arith.constant 16 : index
    %105 = vector.load %arg11[%c0_63, %c16] : memref<8x32xf32, #tpu.memory_space<vmem>>, vector<8x8xf32>
    tpu.vector_store %arg11[%c0_63, %c16], %104 {strides = array<i32>} : memref<8x32xf32, #tpu.memory_space<vmem>>, vector<8x8xf32>,
    %106 = vector.extract_strided_slice %8 {offsets = [0, 24], sizes = [8, 8], strides = [1, 1]} : vector<8x32xf32> to vector<8x8xf32>
    %107 = vector.extract_strided_slice %17 {offsets = [0, 24], sizes = [8, 8], strides = [1, 1]} : vector<8x32xf32> to vector<8x8xf32>
    %108 = vector.extract_strided_slice %26 {offsets = [0, 24], sizes = [8, 8], strides = [1, 1]} : vector<8x32xf32> to vector<8x8xf32>
    %109 = tpu.transpose %107, [1, 0] : vector<8x8xf32> -> vector<8x8xf32>
    %cst_64 = arith.constant dense<0.000000e+00> : vector<8x8xf32>
    %110 = tpu.matmul %106, %109, %cst_64 {dimension_numbers = #tpu.dot_dimension_numbers<[1], [0], [0], [1], [0, 0, 1, 1], [], []>} : vector<8x8xf32>, vector<8x8xf32>, vector<8x8xf32> -> vector<8x8xf32>
    %cst_65 = arith.constant 0.353553385 : f32
    %111 = vector.broadcast %cst_65 : f32 to vector<8x8xf32>
    %112 = arith.mulf %110, %111 : vector<8x8xf32>
    %cst_66 = arith.constant -1.000000e+10 : f32
    %113 = vector.shape_cast %30 : vector<1x8xi1> to vector<1x8xi1>
    %114 = vector.broadcast %113 : vector<1x8xi1> to vector<8x8xi1>
    %115 = vector.broadcast %cst_66 : f32 to vector<8x8xf32>
    %116 = arith.select %114, %112, %115 : vector<8x8xi1>, vector<8x8xf32>
    %cst_67 = arith.constant dense<0xFF800000> : vector<8xf32>
    %117 = vector.multi_reduction <maximumf>, %116, %cst_67 [1] : vector<8x8xf32> to vector<8xf32>
    %118 = vector.shape_cast %117 : vector<8xf32> to vector<8x1xf32>
    %119 = vector.broadcast %118 : vector<8x1xf32> to vector<8x8xf32>
    %120 = arith.subf %116, %119 : vector<8x8xf32>
    %121 = math.exp %120 : vector<8x8xf32>
    %cst_68 = arith.constant dense<0.000000e+00> : vector<8xf32>
    %122 = vector.multi_reduction <add>, %121, %cst_68 [1] : vector<8x8xf32> to vector<8xf32>
    %123 = vector.shape_cast %122 : vector<8xf32> to vector<8x1xf32>
    %124 = vector.broadcast %123 : vector<8x1xf32> to vector<8x8xf32>
    %125 = arith.divf %121, %124 : vector<8x8xf32>
    %c0_69 = arith.constant 0 : index
    %c3 = arith.constant 3 : index
    %c0_70 = arith.constant 0 : index
    %c0_71 = arith.constant 0 : index
    %126 = vector.load %arg10[%c0_69, %c3, %c0_70, %c0_71] : memref<1x4x8x8xf32, #tpu.memory_space<vmem>>, vector<1x1x8x8xf32>
    %127 = vector.shape_cast %126 : vector<1x1x8x8xf32> to vector<8x8xf32>
    %128 = vector.shape_cast %125 : vector<8x8xf32> to vector<1x1x8x8xf32>
    tpu.vector_store %arg10[%c0_69, %c3, %c0_70, %c0_71], %128 {strides = array<i32>} : memref<1x4x8x8xf32, #tpu.memory_space<vmem>>, vector<1x1x8x8xf32>,
    %cst_72 = arith.constant dense<0.000000e+00> : vector<8x8xf32>
    %129 = tpu.matmul %125, %108, %cst_72 {dimension_numbers = #tpu.dot_dimension_numbers<[1], [0], [0], [1], [0, 0, 1, 1], [], []>} : vector<8x8xf32>, vector<8x8xf32>, vector<8x8xf32> -> vector<8x8xf32>
    %c0_73 = arith.constant 0 : index
    %c24 = arith.constant 24 : index
    %130 = vector.load %arg11[%c0_73, %c24] : memref<8x32xf32, #tpu.memory_space<vmem>>, vector<8x8xf32>
    tpu.vector_store %arg11[%c0_73, %c24], %129 {strides = array<i32>} : memref<8x32xf32, #tpu.memory_space<vmem>>, vector<8x8xf32>,
    %c0_74 = arith.constant 0 : index
    %c0_75 = arith.constant 0 : index
    %131 = vector.load %arg11[%c0_74, %c0_75] : memref<8x32xf32, #tpu.memory_space<vmem>>, vector<8x32xf32>
    %c0_76 = arith.constant 0 : index
    %c0_77 = arith.constant 0 : index
    %132 = vector.load %arg7[%c0_76, %c0_77] : memref<32x32xf32, #tpu.memory_space<vmem>>, vector<32x32xf32>
    %cst_78 = arith.constant dense<0.000000e+00> : vector<8x32xf32>
    %133 = tpu.matmul %131, %132, %cst_78 {dimension_numbers = #tpu.dot_dimension_numbers<[1], [0], [0], [1], [0, 0, 1, 1], [], []>} : vector<8x32xf32>, vector<32x32xf32>, vector<8x32xf32> -> vector<8x32xf32>
    %c0_79 = arith.constant 0 : index
    %c0_80 = arith.constant 0 : index
    %134 = vector.load %arg8[%c0_79, %c0_80] : memref<1x32xf32, #tpu.memory_space<vmem>>, vector<1x32xf32>
    %135 = vector.broadcast %134 : vector<1x32xf32> to vector<8x32xf32>
    %136 = arith.addf %133, %135 : vector<8x32xf32>
    %c0_81 = arith.constant 0 : index
    %c0_82 = arith.constant 0 : index
    %c0_83 = arith.constant 0 : index
    %137 = vector.load %arg9[%c0_81, %c0_82, %c0_83] : memref<1x8x32xf32, #tpu.memory_space<vmem>>, vector<1x8x32xf32>
    %138 = vector.shape_cast %137 : vector<1x8x32xf32> to vector<8x32xf32>
    %139 = vector.shape_cast %136 : vector<8x32xf32> to vector<1x8x32xf32>
    tpu.vector_store %arg9[%c0_81, %c0_82, %c0_83], %139 {strides = array<i32>} : memref<1x8x32xf32, #tpu.memory_space<vmem>>, vector<1x8x32xf32>,
    return
  }
  func.func @transform_0(%arg0: i32) -> (i32, i32, i32) {
    %c0_i32 = arith.constant 0 : i32
    %c0_i32_0 = arith.constant 0 : i32
    %c0_i32_1 = arith.constant 0 : i32
    return %arg0, %c0_i32, %c0_i32_0 : i32, i32, i32
  }
  func.func @transform_1(%arg0: i32) -> (i32, i32, i32) {
    %c0_i32 = arith.constant 0 : i32
    %c0_i32_0 = arith.constant 0 : i32
    %c0_i32_1 = arith.constant 0 : i32
    return %arg0, %c0_i32, %c0_i32_0 : i32, i32, i32
  }
  func.func @transform_2(%arg0: i32) -> (i32, i32, i32) {
    %c0_i32 = arith.constant 0 : i32
    %c0_i32_0 = arith.constant 0 : i32
    %c0_i32_1 = arith.constant 0 : i32
    return %arg0, %c0_i32, %c0_i32_0 : i32, i32, i32
  }
  func.func @transform_3(%arg0: i32) -> (i32, i32, i32) {
    %c0_i32 = arith.constant 0 : i32
    %c0_i32_0 = arith.constant 0 : i32
    %c0_i32_1 = arith.constant 0 : i32
    return %arg0, %c0_i32, %c0_i32_0 : i32, i32, i32
  }
  func.func @transform_4(%arg0: i32) -> (i32, i32, i32) {
    %c0_i32 = arith.constant 0 : i32
    %c0_i32_0 = arith.constant 0 : i32
    %c0_i32_1 = arith.constant 0 : i32
    %c0_i32_2 = arith.constant 0 : i32
    return %c0_i32, %c0_i32_0, %c0_i32_1 : i32, i32, i32
  }
  func.func @transform_5(%arg0: i32) -> (i32, i32, i32) {
    %c0_i32 = arith.constant 0 : i32
    %c0_i32_0 = arith.constant 0 : i32
    %c0_i32_1 = arith.constant 0 : i32
    %c0_i32_2 = arith.constant 0 : i32
    return %c0_i32, %c0_i32_0, %c0_i32_1 : i32, i32, i32
  }
  func.func @transform_6(%arg0: i32) -> (i32, i32) {
    %c0_i32 = arith.constant 0 : i32
    %c0_i32_0 = arith.constant 0 : i32
    %c0_i32_1 = arith.constant 0 : i32
    return %c0_i32, %c0_i32_0 : i32, i32
  }
  func.func @transform_7(%arg0: i32) -> (i32, i32) {
    %c0_i32 = arith.constant 0 : i32
    %c0_i32_0 = arith.constant 0 : i32
    %c0_i32_1 = arith.constant 0 : i32
    return %c0_i32, %c0_i32_0 : i32, i32
  }
  func.func @transform_8(%arg0: i32) -> (i32, i32, i32) {
    %c0_i32 = arith.constant 0 : i32
    %c0_i32_0 = arith.constant 0 : i32
    %c0_i32_1 = arith.constant 0 : i32
    return %arg0, %c0_i32, %c0_i32_0 : i32, i32, i32
  }
  func.func @transform_9(%arg0: i32) -> (i32, i32, i32, i32) {
    %c0_i32 = arith.constant 0 : i32
    %c0_i32_0 = arith.constant 0 : i32
    %c0_i32_1 = arith.constant 0 : i32
    %c0_i32_2 = arith.constant 0 : i32
    return %arg0, %c0_i32, %c0_i32_0, %c0_i32_1 : i32, i32, i32, i32
  }
}

</mosaic_0001>

<bundles_post_ra>
// kernel: multi_head_attention.1
= control target key start
LH: loop header
LB: loop body
LE: loop exit
PB: predicated region body
PF: predicated region fallthrough
CT: control target
= control target key end

     0   :  { %s1984_s0 = inlined_call_operand.hbm [shape: f32[2,8,32], index: 0, kind: input, shape index: {}]   ;;  %s1985_s1 = inlined_call_operand.hbm [shape: f32[2,8,32], index: 1, kind: input, shape index: {}]   ;;  %s1986_s2 = inlined_call_operand.hbm [shape: f32[2,8,32], index: 2, kind: input, shape index: {}]   ;;  %s1987_s3 = inlined_call_operand.vmem [shape: f32[2,1,8], index: 3, kind: input, shape index: {}]   ;;  %s1988_s4 = inlined_call_operand.hbm [shape: f32[3,32,32], index: 4, kind: input, shape index: {}]   ;;  %s1989_s5 = inlined_call_operand.vmem [shape: f32[3,1,32], index: 5, kind: input, shape index: {}]   ;;  %s1990_s6 = inlined_call_operand.hbm [shape: f32[32,32], index: 6, kind: input, shape index: {}]   ;;  %s1991_s7 = inlined_call_operand.vmem [shape: f32[1,32], index: 7, kind: input, shape index: {}]   ;;  %s1992_s8 = inlined_call_operand.hbm [shape: f32[2,8,32], index: 8, kind: output, shape index: {0}]   ;;  %s1993_s9 = inlined_call_operand.hbm [shape: f32[2,4,8,8], index: 9, kind: output, shape index: {1}]  }
   0x1   :  { %2004 = sst [smem:[#allocation25_spill]] %s1985_s1 }
   0x2   :  { %2005 = sst [smem:[#allocation26_spill]] %s1988_s4 }
   0x3   :  { %2006 = sst [smem:[#allocation27_spill]] %s1991_s7 }
   0x4   :  { %2007 = sst [smem:[#allocation28_spill]] %s1992_s8 }
   0x5   :  { %15 = vsyncpa [#allocation4], 0 }
   0x6   :  { %17 = vsyncpa [#allocation4 + $0x1], 0 }
   0x7   :  { %18 = vsyncpa [#allocation7], 0 }
   0x8   :  { %20 = vsyncpa [#allocation7 + $0x1], 0 }
   0x9   :  { %21 = vsyncpa [#allocation10], 0 }
   0xa   :  { %22 = vsyncpa [#allocation5], 0 }
   0xb   :  { %24 = vsyncpa [#allocation5 + $0x1], 0 }
   0xc   :  { %25 = vsyncpa [#allocation14], 0 }
   0xd   :  { %27 = vsyncpa [#allocation14 + $0x1], 0  ;;  %s1657_s30 = smov 0   ;;  %s1659_s10 = smov 0  }
   0xe   :  { %s1661_s11 = smov 0   ;;  %s1663_s12 = smov 0  }
   0xf LB: > { %2008 = sst [smem:[#allocation20_spill]] %s1581_s30  ;;  %s1681_s16 = sadd.s32 4294967295, %s1593_s12   ;;  %s1593_s12 = sphi %s1663_s12, %s2034_s12   ;;  %s1589_s11 = sphi %s1661_s11, %s2038_s11   ;;  %s1585_s10 = sphi %s1659_s10, %s2037_s10   ;;  %s1581_s30 = sphi %s1657_s30, %s2036_s30  }
  0x10   : > { %2009 = sst [smem:[#allocation21_spill]] %s1593_s12  ;;  %p1178_p0 = scmp.ge.s32.totalorder %s1593_s12, 1 }
  0x11   : > { %s2010_s4 = sld [smem:[#allocation26_spill]]  ;;  %p2003_p1 = scmp.eq.s32.totalorder %s1681_s16, 0 }
  0x12   : > { %p278_p2 = scmp.lt.s32.totalorder %s1593_s12, 3  ;;  %s1595_s18 = smov [#allocation9]  }
  0x13   : > { %s291_s19 = sshll.u32 %s1595_s18, 4  ;;  %s1994_s21 = smov 128   ;;  %s292_s19 = int_to_ptr.vmem [resolvable:$true] %s291_s19 }
  0x14   : > { %p1686_p3 = pnand %p1178_p0, %p278_p2  ;;  %s1995_s22 = smov 8  }
  0x15   : > { %s1177_s23 = sadd.s32 4294967294, %s1593_s12   ;;  %s1706_s24 = sadd.s32 1, %s1593_s12  }
  0x16   : > { %p1243_p4 = pneg %p1686_p3  ;;  %2013 = sst [smem:[#allocation22_spill]] %s1706_s24 }
  0x17   : > { %s289_s15 = sshll.u32 %s2010_s4, 4  ;;  %s40_s25 = sadd.s32 1, %s1589_s11  ;;  %s290_s15 = int_to_ptr.hbm [resolvable:$true] %s289_s15 }
  0x18   : > { %p1695_p6 = pnand %p1243_p4, %p2003_p1  ;;  %s37_s26 = ssub.s32 %s1593_s12, %s1706_s24 }
  0x19   : > { %p47_p7 = scmp.ne.s32.totalorder %s1589_s11, %s1585_s10  ;;  %p38_p8 = scmp.eq.s32.totalorder %s37_s26, 0 }
  0x1a   : > { %1246 = dma.hbm_to_vmem [thread:$0]  (!%p1695_p6), %s290_s15, 1536, %s292_s19, [#allocation10], %s1994_s21, %s1994_s21, %s1995_s22  }
  0x1b   : > { %p48_p9 = scmp.eq.s32.totalorder %s1593_s12, 0  ;;  %p53_p10 = scmp.ne.s32.totalorder %s1585_s10, %s1581_s30 }
  0x1c   : > { %p239_p11 = scmp.eq.s32.totalorder %s1681_s16, 1  ;;  %p245_p2 = scmp.eq.s32.totalorder %s1177_s23, 1 }
  0x1d   : > { %s1718_s27 = scalar_select %p38_p8, %s1589_s11, %s40_s25  }
  0x1e   : > { %p49_p12 = por %p48_p9, %p47_p7  ;;  %p1722_p13 = por %p2003_p1, %p53_p10 }
  0x1f   : > { %2014 = sst [smem:[#allocation23_spill]] %s1718_s27  ;;  %p1726_p0 = por %p239_p11, %p47_p7 }
  0x20   : > { %p1269_p4 = scmp.lt.s32.totalorder %s1593_s12, 2  ;;  %s1996_s13 = sand.u32 1, %s1589_s11  }
  0x21   : > { %p1732_p5 = por %p245_p2, %p53_p10  ;;  %s1738_s15 = sshll.u32 %s1996_s13, 3 }
  0x22   : > { %s1741_s18 = sshll.u32 %s1593_s12, 3  ;;  %p1743_p8 = pnand %p1269_p4, %p49_p12 }
  0x23   : > { %s2017_s14 = scalar_select %p1732_p5, 1, 0 }
  0x24   : > { %s344_s23 = sand.u32 1, %s1593_s12   ;;  %s2020_s1 = sld [smem:[#allocation25_spill]] }
  0x25   : > { %2018 = sst [smem:[#allocation24_spill]] %s2017_s14  ;;  %s348_s22 = scalar_lea.vmem [#allocation6], %s1738_s15 }
  0x26   : > { %s356_s4 = sshll.u32 %s348_s22, 4  ;;  %s306_s14 = sshll.u32 %s1990_s6, 4  ;;  %s357_s4 = int_to_ptr.vmem [resolvable:$true] %s356_s4  ;;  %s307_s14 = int_to_ptr.hbm [resolvable:$true] %s306_s14 }
  0x27   : > { %s1756_s30 = scalar_lea.sflag [#allocation7], %s344_s23  ;;  %p1371_p9 = pneg %p1743_p8 }
  0x2a   : > { %s352_s21 = scalar_lea.hbm %s2020_s1, %s1741_s18  ;;  %s1374_s25 = scalar_lea.hbm %s2020_s1, 16 }
  0x2b   : > { %s354_s27 = sshll.u32 %s352_s21, 4  ;;  %s355_s27 = int_to_ptr.hbm [resolvable:$true] %s354_s27 }
  0x2c   : > { %s1367_s7 = sshra.s32 %s355_s27, 4  ;;  %s1368_s7 = int_to_ptr.hbm [resolvable:$true] %s1367_s7 }
  0x2d   : > { %s1369_s8 = scalar_lea.hbm %s1368_s7, 8  ;;  %p1375_p12 = scmp.lt.s32.totalorder %s1368_s7, %s2020_s1 }
  0x2e   : > { %p1370_p7 = scmp.ne.s32.totalorder %s1368_s7, %s1369_s8  ;;  %p1376_p2 = scmp.lt.s32.totalorder %s1374_s25, %s1369_s8 }
  0x30   : > { %p1372_p10 = pnand %p1371_p9, %p1370_p7  ;;  %p1377_p4 = por %p1376_p2, %p1375_p12 }
  0x32   : > { %p1373_p11 = pneg %p1372_p10 }
  0x34   : > { %p1378_p1 = pnand %p1377_p4, %p1373_p11 }
  0x36   : > { %1381 = shalt.err (!%p1378_p1)
}
  0x37   : > { %1256 = dma.hbm_to_vmem [thread:$0]  (!%p1743_p8), %s355_s27, 128, %s357_s4, %s1756_s30  }
  0x38   : > { %s1598_s24 = smov [#allocation11]   ;;  %s2021_s12 = smov 8  }
  0x39   : > { %s308_s13 = sshll.u32 %s1598_s24, 4  ;;  %s2022_s7 = smov 128   ;;  %s309_s13 = int_to_ptr.vmem [resolvable:$true] %s308_s13 }
  0x3a   : > { %1249 = dma.hbm_to_vmem [thread:$0]  (!%p1695_p6), %s307_s14, 512, %s309_s13, [#allocation10], %s2022_s7, %s2022_s7, %s2021_s12  }
  0x3b   : > { %s333_s22 = scalar_lea.hbm %s1984_s0, %s1741_s18  ;;  %s329_s21 = scalar_lea.vmem [#allocation3], %s1738_s15 }
  0x3c   : > { %s337_s25 = sshll.u32 %s329_s21, 4  ;;  %s335_s26 = sshll.u32 %s333_s22, 4  ;;  %s338_s25 = int_to_ptr.vmem [resolvable:$true] %s337_s25  ;;  %s336_s26 = int_to_ptr.hbm [resolvable:$true] %s335_s26 }
  0x3d   : > { %s2023_s4 = sand.u32 1, %s1589_s11   ;;  %s1427_s1 = sshra.s32 %s336_s26, 4  ;;  %s1428_s1 = int_to_ptr.hbm [resolvable:$true] %s1427_s1 }
  0x3e   : > { %s326_s27 = scalar_lea.sflag [#allocation4], %s2023_s4  ;;  %s1429_s24 = scalar_lea.hbm %s1428_s1, 8 }
  0x3f   : > { %p1430_p1 = scmp.ne.s32.totalorder %s1428_s1, %s1429_s24  ;;  %s1434_s13 = scalar_lea.hbm %s1984_s0, 16 }
  0x40   : > { %p1435_p6 = scmp.lt.s32.totalorder %s1428_s1, %s1984_s0  ;;  %p1436_p11 = scmp.lt.s32.totalorder %s1434_s13, %s1429_s24 }
  0x41   : > { %p1432_p7 = pnand %p1430_p1, %p1371_p9 }
  0x42   : > { %p1437_p12 = por %p1436_p11, %p1435_p6 }
  0x43   : > { %p1433_p10 = pneg %p1432_p7 }
  0x45   : > { %p1438_p2 = pnand %p1437_p12, %p1433_p10 }
  0x47   : > { %1441 = shalt.err (!%p1438_p2)
}
  0x48   : > { %1253 = dma.hbm_to_vmem [thread:$0]  (!%p1743_p8), %s336_s26, 128, %s338_s25, %s326_s27  }
  0x49   : > { %s371_s22 = scalar_lea.hbm %s1986_s2, %s1741_s18  ;;  %s367_s21 = scalar_lea.vmem [#allocation8], %s1738_s15 }
  0x4a   : > { %s375_s4 = sshll.u32 %s367_s21, 4  ;;  %s373_s20 = sshll.u32 %s371_s22, 4  ;;  %s376_s4 = int_to_ptr.vmem [resolvable:$true] %s375_s4  ;;  %s374_s20 = int_to_ptr.hbm [resolvable:$true] %s373_s20 }
  0x4b   : > { %s1457_s1 = sshra.s32 %s374_s20, 4  ;;  %s1464_s25 = scalar_lea.hbm %s1986_s2, 16  ;;  %s1458_s1 = int_to_ptr.hbm [resolvable:$true] %s1457_s1 }
  0x4c   : > { %s1459_s24 = scalar_lea.hbm %s1458_s1, 8  ;;  %p1465_p10 = scmp.lt.s32.totalorder %s1458_s1, %s1986_s2 }
  0x4d   : > { %p1460_p4 = scmp.ne.s32.totalorder %s1458_s1, %s1459_s24  ;;  %p1466_p6 = scmp.lt.s32.totalorder %s1464_s25, %s1459_s24 }
  0x4f   : > { %p1462_p1 = pnand %p1460_p4, %p1371_p9  ;;  %p1467_p11 = por %p1466_p6, %p1465_p10 }
  0x51   : > { %p1463_p7 = pneg %p1462_p1 }
  0x53   : > { %p1468_p12 = pnand %p1467_p11, %p1463_p7 }
  0x55   : > { %1471 = shalt.err (!%p1468_p12)
}
  0x56   : > { %1259 = dma.hbm_to_vmem [thread:$0]  (!%p1743_p8), %s374_s20, 128, %s376_s4, %s1756_s30  }
  0x57   : > { %390 = sbr.rel (%p1686_p3) target bundleno = 1151 (0x47f), region = 52  ;;  %s1815_s15 = sand.u32 (!%p1686_p3), 1, %s1585_s10  }
  0x58   : > { %s1818_s18 = sshll.u32 (!%p1686_p3), %s1815_s15, 3  ;;  %s393_s12 = scalar_lea.sflag (!%p1686_p3), [#allocation4], %s1815_s15 }
  0x59   : > { %s396_s7 = scalar_lea.vmem (!%p1686_p3), [#allocation3], %s1818_s18 }
  0x5c   : > { %1560 = dma.done.wait (%p1722_p13), %s393_s12, 128  }
  0x5d   : > { %1562 = vsyncadd (%p1722_p13), %s393_s12, 4294967168  ;;  %s402_s30 = sand.u32 1, %s1681_s16   ;;  %s406_s19 = scalar_lea.vmem [#allocation6], %s1818_s18 }
  0x5e   : > { %s403_s17 = scalar_lea.sflag [#allocation7], %s402_s30 }
  0x5f   : > { %1564 = dma.done.wait (%p1722_p13), %s403_s17, 256  }
  0x60   : > { %1566 = vsyncadd (%p1722_p13), %s403_s17, 4294967040  ;;  %s416_s8 = scalar_lea.vmem [#allocation8], %s1818_s18  ;;  %p2024_p3 = scmp.eq.s32.totalorder %s1681_s16, 0 }
  0x62   : > { %1568 = dma.done.wait (%p2024_p3), [#allocation10], 2048   ;;  %p2025_p8 = pmov %p2024_p3 }
  0x63   : > { %v521_v0 = vld [vmem:[#allocation9 + $0x38] sm:$0xff]  ;;  %v520_v1 = vld [vmem:[#allocation9 + $0x30] sm:$0xff]  ;;  %v519_v4 = vld [vmem:[#allocation9 + $0x28] sm:$0xff]  ;;  %vm492_vm0 = vcmask 261120   ;;  %vm586_vm1 = vcmask 64512   ;;  %s1599_s4 = smov 104  }
  0x64   : > { %1570 = vsyncadd (%p2025_p8), [#allocation10], 4294965248  ;;  %v487_v2 = vld [vmem:[#allocation9 + $0x18] sm:$0xff]  ;;  %542 = vmatpush.msra.mxu1 %v521_v0  ;;  %v486_v3 = vld [vmem:[#allocation9 + $0x10] sm:$0xff]  ;;  %s1600_s20 = smov 120   ;;  %s1601_s1 = smov 112  }
  0x65   : > { %508 = vmatpush.msra.mxu0 %v487_v2  ;;  %v485_v5 = vld [vmem:[#allocation9 + $0x8] sm:$0xff]  ;;  %v518_v6 = vld [vmem:[#allocation9 + $0x20] sm:$0xff]  ;;  %v483_v9 = vld [vmem:[%s396_s7] sm:$0xff]  ;;  %p480_p13 = scmp.lt.s32.totalorder %s1681_s16, 1  ;;  %v1602_v27 = vmov 0   ;;  %s1195_s12 = sshll.u32 %s1815_s15, 5 }
  0x66   : > { %543 = vmatpush.msra.mxu1 %v520_v1  ;;  %v484_v7 = vld [vmem:[#allocation9] sm:$0xff]  ;;  %v1317_v10 = vld [vmem:[%s1989_s5 + $0x1] ss:$0 sm:$0xff]  ;;  %v1318_v11 = vld [vmem:[%s1989_s5] ss:$0 sm:$0xff]  ;;  %s1903_s7 = scalar_lea.vmem [#allocation13], %s1195_s12 }
  0x67   : > { %509 = vmatpush.msra.mxu0 %v486_v3  ;;  %v516_v8 = vld [vmem:[%s406_s19] sm:$0xff]  ;;  %v555_v16 = vld [vmem:[#allocation9 + $0x58] sm:$0xff]  ;;  %v554_v17 = vld [vmem:[#allocation9 + $0x50] sm:$0xff]  ;;  %s481_s24 = scalar_select %p480_p13, %s1681_s16, 1 }
  0x68   : > { %544 = vmatpush.msra.mxu1 %v519_v4  ;;  %576 = vmatpush.msra.mxu2 %v555_v16  ;;  %v553_v18 = vld [vmem:[#allocation9 + $0x48] sm:$0xff]  ;;  %v552_v19 = vld [vmem:[#allocation9 + $0x40] sm:$0xff]  ;;  %v550_v20 = vld [vmem:[%s416_s8] sm:$0xff]  ;;  %s1603_s30 = smov 8   ;;  %s1604_s17 = smov 16  }
  0x69   : > { %510 = vmatpush.msra.mxu0 %v485_v5  ;;  %s482_s25 = scalar_lea.vmem %s1987_s3, %s481_s24  ;;  %v1319_v36 = vld [vmem:[%s1989_s5 + $0x2] ss:$0 sm:$0xff]  ;;  %s1605_s19 = smov 24  }
  0x6a   : > { %545 = vmatpush.msra.mxu1 %v518_v6  ;;  %577 = vmatpush.msra.mxu2 %v554_v17  ;;  %v584_v25 = vld [vmem:[%s482_s25] sm:$0x1]  ;;  %s1224_s8 = sshll.u32 %s1681_s16, 5  ;;  %s997_s21 = sshll.u32 %s1903_s7, 4  ;;  %s998_s21 = int_to_ptr.vmem [resolvable:$true] %s997_s21 }
  0x6b   : > { %511 = vmatpush.msra.mxu0 %v484_v7  ;;  %1198 = vmatmul.msk.f32.vlgmr.msra.gmra.mxu1 %vm492_vm0, %v516_v8  ;;  %vm585_vm2 = vcmp.ne.f32.partialorder %v584_v25, 0.0  ;;  %s996_s22 = scalar_lea.hbm %s1993_s9, %s1224_s8  ;;  %s1507_s25 = scalar_lea.hbm %s1993_s9, 64 }
  0x6c   : > { %1196 = vmatmul.msk.f32.vlgmr.msra.gmra.mxu0 %vm492_vm0, %v483_v9  ;;  %578 = vmatpush.msra.mxu2 %v553_v18  ;;  %v614_v28 = vsel %vm585_vm2, 1, %v1602_v27 }
  0x6d   : > { %v615_v30 = vperm.slane %v614_v28, 0 }
  0x6e   : > { %579 = vmatpush.msra.mxu2 %v552_v19 }
  0x6f   : > { %1200 = vmatmul.msk.f32.vlgmr.msra.gmra.mxu2 %vm492_vm0, %v550_v20  ;;  %vm1867_vm3 = vcmp.eq.s32.totalorder %v615_v30, 1 }
  0xe8   : > { %v547_v12 = vpop.f32.mrf.mxu1 }
  0xe9   : > { %v513_v13 = vpop.f32.mrf.mxu0  ;;  %v548_v14 = vadd.f32 %v1317_v10, %v547_v12 }
  0xea   : > { %v514_v15 = vadd.f32 %v1318_v11, %v513_v13 }
  0xeb   : > { %846 = vrot.lane.b32.xlu2 %v548_v14, %s1599_s4  ;;  %669 = vrot.lane.b32.xlu1 %v548_v14, %s1600_s20 }
  0xec   : > { %758 = vrot.lane.b32.xlu0 %v548_v14, %s1601_s1  ;;  %1201 = vmatpush.xpose.msk.msra.mxu3 %vm586_vm1, %v548_v14 }
  0xef   : > { %1202 = vmatmul.msk.f32.vlgmr.msra.gmra.mxu3 %vm586_vm1, %v514_v15 }
  0xf2   : > { %v581_v37 = vpop.f32.mrf.mxu2 }
  0xf3   : > { %844 = vrot.lane.b32.xlu2 %v514_v15, %s1599_s4  ;;  %667 = vrot.lane.b32.xlu1 %v514_v15, %s1600_s20  ;;  %v1877_v38 = vadd.f32 %v1319_v36, %v581_v37 }
  0xf4   : > { %756 = vrot.lane.b32.xlu0 %v514_v15, %s1601_s1 }
  0xf5   : > { %661 = vmatpush.msrb.mxu3 %v1877_v38 }
 0x145   : > { %v847_v22 = vpop.permute.xlu2 %846 }
 0x14d   : > { %v845_v29 = vpop.permute.xlu2 %844 }
 0x15d   : > { %v670_v21 = vpop.permute.xlu1 %669 }
 0x15e   : > { %v759_v23 = vpop.permute.xlu0 %758  ;;  %1204 = vmatpush.xpose.msk.msrb.mxu0 %vm586_vm1, %v670_v21 }
 0x15f   : > { %1208 = vmatpush.xpose.msk.msrb.mxu2 %vm586_vm1, %v759_v23 }
 0x162   : > { %1212 = vmatpush.xpose.msk.msra.mxu0 %vm586_vm1, %v847_v22 }
 0x165   : > { %v668_v24 = vpop.permute.xlu1 %667 }
 0x166   : > { %v757_v26 = vpop.permute.xlu0 %756  ;;  %1205 = vmatmul.msk.f32.vlgmr.msrb.gmra.mxu0 %vm586_vm1, %v668_v24 }
 0x167   : > { %1209 = vmatmul.msk.f32.vlgmr.msrb.gmra.mxu2 %vm586_vm1, %v757_v26 }
 0x16e   : > { %1213 = vmatmul.msk.f32.vlgmr.msra.gmra.mxu0 %vm586_vm1, %v845_v29 }
 0x172   : > { %v610_v31 = vpop.f32.mrf.mxu3 }
 0x173   : > { %v613_v33 = vmul.f32 0.35355338, %v610_v31 }
 0x175   : > { %v617_v34 = vsel %vm1867_vm3, %v613_v33, -1e+10 }
 0x176   : > { %v618_v35 = vsel %vm586_vm1, %v617_v34, -inf }
 0x177   : > { %619 = vmax.xlane.f32.xlu0 %v618_v35 }
 0x1e3   : > { %v692_v39 = vpop.f32.mrf.mxu0 }
 0x1e4   : > { %v695_v40 = vmul.f32 0.35355338, %v692_v39 }
 0x1e6   : > { %v696_v41 = vsel %vm1867_vm3, %v695_v40, -1e+10 }
 0x1e7   : > { %v697_v42 = vsel %vm586_vm1, %v696_v41, -inf }
 0x1e8   : > { %698 = vmax.xlane.f32.xlu1 %v697_v42 }
 0x1ea   : > { %v781_v43 = vpop.f32.mrf.mxu2  ;;  %v620_v44 = vpop.xlane.xlu0 %619 }
 0x1eb   : > { %v784_v45 = vmul.f32 0.35355338, %v781_v43  ;;  %v621_v46 = vsub.f32 %v617_v34, %v620_v44  ;;  %v869_v47 = vpop.f32.mrf.mxu0 }
 0x1ec   : > { %v872_v51 = vmul.f32 0.35355338, %v869_v47 }
 0x1ed   : > { %v622_v48 = vmul.f32 1.442695, %v621_v46  ;;  %v785_v49 = vsel %vm1867_vm3, %v784_v45, -1e+10 }
 0x1ee   : > { %v786_v50 = vsel %vm586_vm1, %v785_v49, -inf  ;;  %v873_v52 = vsel %vm1867_vm3, %v872_v51, -1e+10 }
 0x1ef   : > { %1321 = vpow2.f32 %v622_v48  ;;  %787 = vmax.xlane.f32.xlu2 %v786_v50  ;;  %v874_v54 = vsel %vm586_vm1, %v873_v52, -inf }
 0x1f5   : > { %v1322_v53 = vpop.eup %1321 }
 0x1f6   : > { %v624_v55 = vsel %vm586_vm1, %v1322_v53, 0.0 }
 0x1f7   : > { %875 = vmax.xlane.f32.xlu2 %v874_v54  ;;  %625 = vadd.xlane.f32.xlu0 %v624_v55 }
 0x25b   : > { %v699_v56 = vpop.xlane.xlu1 %698 }
 0x25c   : > { %v700_v57 = vsub.f32 %v696_v41, %v699_v56 }
 0x25e   : > { %v701_v58 = vmul.f32 1.442695, %v700_v57 }
 0x260   : > { %1323 = vpow2.f32 %v701_v58 }
 0x262   : > { %v788_v59 = vpop.xlane.xlu2 %787 }
 0x263   : > { %v789_v60 = vsub.f32 %v785_v49, %v788_v59 }
 0x265   : > { %v790_v61 = vmul.f32 1.442695, %v789_v60 }
 0x266   : > { %v1890_v62 = vpop.eup %1323 }
 0x267   : > { %1325 = vpow2.f32 %v790_v61  ;;  %v703_v63 = vsel %vm586_vm1, %v1890_v62, 0.0 }
 0x268   : > { %704 = vadd.xlane.f32.xlu1 %v703_v63  ;;  %v935_v63 = vld [vmem:[#allocation11 + $0x10] sm:$0xff] }
 0x26a   : > { %v876_v0 = vpop.xlane.xlu2 %875  ;;  %v626_v1 = vpop.xlane.xlu0 %625 }
 0x26b   : > { %v877_v2 = vsub.f32 %v873_v52, %v876_v0  ;;  %1327 = vrcp.f32 %v626_v1  ;;  %v638_v10 = vand.u32 2147483648, %v626_v1  ;;  %v636_v12 = vand.u32 2147483647, %v626_v1  ;;  %v934_v0 = vld [vmem:[#allocation11 + $0x8] sm:$0xff] }
 0x26c   : > { %vm632_vm5 = vweird.f32 %v626_v1 }
 0x26d   : > { %v1894_v3 = vpop.eup %1325  ;;  %v878_v4 = vmul.f32 1.442695, %v877_v2  ;;  %v639_v15 = vor.u32 1.1754944e-38, %v638_v10  ;;  %vm637_vm7 = vcmp.eq.f32.partialorder %v636_v12, 8.507059e+37 }
 0x26e   : > { %v792_v5 = vsel %vm586_vm1, %v1894_v3, 0.0 }
 0x26f   : > { %1329 = vpow2.f32 %v878_v4  ;;  %793 = vadd.xlane.f32.xlu2 %v792_v5 }
 0x271   : > { %v1328_v6 = vpop.eup %1327 }
 0x272   : > { %v628_v7 = vmul.f32 %v1328_v6, %v626_v1  ;;  %vm633_vm4 = vweird.f32 %v1328_v6  ;;  %v933_v1 = vld [vmem:[#allocation11] sm:$0xff] }
 0x273   : > { %vm634_vm6 = vmor %vm632_vm5, %vm633_vm4 }
 0x274   : > { %v629_v8 = vsub.f32 1.0, %v628_v7 }
 0x275   : > { %v1898_v9 = vpop.eup %1329 }
 0x276   : > { %v630_v11 = vmul.f32 %v1328_v6, %v629_v8  ;;  %v880_v13 = vsel %vm586_vm1, %v1898_v9, 0.0 }
 0x277   : > { %881 = vadd.xlane.f32.xlu0 %v880_v13 }
 0x278   : > { %v631_v14 = vadd.f32 %v1328_v6, %v630_v11 }
 0x27a   : > { %v635_v16 = vsel %vm634_vm6, %v1328_v6, %v631_v14  ;;  %vm842_vm6 = vcmask 195712  }
 0x27b   : > { %v640_v17 = vsel %vm637_vm7, %v639_v15, %v635_v16  ;;  %vm930_vm7 = vcmask 261312  }
 0x27c   : > { %v641_v18 = vmul.f32 %v1322_v53, %v640_v17 }
 0x27e   : > { %642 = vst.msk [vmem:[%s1903_s7] sm:$0xff] %vm586_vm1, %v641_v18  ;;  %1203 = vmatmul.msk.f32.vlgmr.msrb.gmra.mxu3 %vm586_vm1, %v641_v18 }
 0x281   : > { %724 = vrot.lane.b32.xlu1 %v1877_v38, %s1600_s20  ;;  %s971_s20 = scalar_lea.sflag [#allocation14], %s1815_s15 }
 0x287   : > { %812 = vrot.lane.b32.xlu2 %v1877_v38, %s1601_s1 }
 0x28b   : > { %900 = vrot.lane.b32.xlu0 %v1877_v38, %s1599_s4  ;;  %s999_s4 = sshll.u32 %s996_s22, 4  ;;  %s1000_s4 = int_to_ptr.hbm [resolvable:$true] %s999_s4 }
 0x28c   : > { %s1501_s1 = sshra.s32 %s1000_s4, 4  ;;  %s1502_s1 = int_to_ptr.hbm [resolvable:$true] %s1501_s1 }
 0x28d   : > { %s1503_s24 = scalar_lea.hbm %s1502_s1, 32  ;;  %p1508_p1 = scmp.lt.s32.totalorder %s1502_s1, %s1993_s9 }
 0x28e   : > { %p1504_p9 = scmp.ne.s32.totalorder %s1502_s1, %s1503_s24  ;;  %p1509_p7 = scmp.lt.s32.totalorder %s1507_s25, %s1503_s24 }
 0x290   : > { %p1505_p2 = pnand %p1504_p9, %p1726_p0  ;;  %p1510_p10 = por %p1509_p7, %p1508_p1 }
 0x292   : > { %p1506_p4 = pneg %p1505_p2 }
 0x294   : > { %p1511_p6 = pnand %p1510_p10, %p1506_p4 }
 0x2db   : > { %v705_v19 = vpop.xlane.xlu1 %704 }
 0x2dc   : > { %1331 = vrcp.f32 %v705_v19  ;;  %v717_v25 = vand.u32 2147483648, %v705_v19  ;;  %v715_v26 = vand.u32 2147483647, %v705_v19  ;;  %vm711_vm9 = vweird.f32 %v705_v19 }
 0x2de   : > { %v718_v32 = vor.u32 1.1754944e-38, %v717_v25  ;;  %vm716_vm11 = vcmp.eq.f32.partialorder %v715_v26, 8.507059e+37 }
 0x2e2   : > { %v1332_v20 = vpop.eup %1331  ;;  %v794_v21 = vpop.xlane.xlu2 %793 }
 0x2e3   : > { %v707_v22 = vmul.f32 %v1332_v20, %v705_v19  ;;  %1333 = vrcp.f32 %v794_v21  ;;  %vm712_vm8 = vweird.f32 %v1332_v20  ;;  %v806_v35 = vand.u32 2147483648, %v794_v21 }
 0x2e4   : > { %vm713_vm10 = vmor %vm711_vm9, %vm712_vm8  ;;  %v804_v38 = vand.u32 2147483647, %v794_v21  ;;  %vm800_vm13 = vweird.f32 %v794_v21 }
 0x2e5   : > { %v708_v23 = vsub.f32 1.0, %v707_v22  ;;  %v807_v42 = vor.u32 1.1754944e-38, %v806_v35 }
 0x2e6   : > { %vm805_vm15 = vcmp.eq.f32.partialorder %v804_v38, 8.507059e+37 }
 0x2e7   : > { %v709_v24 = vmul.f32 %v1332_v20, %v708_v23 }
 0x2e9   : > { %v1334_v27 = vpop.eup %1333  ;;  %v710_v28 = vadd.f32 %v1332_v20, %v709_v24 }
 0x2ea   : > { %v796_v29 = vmul.f32 %v1334_v27, %v794_v21  ;;  %v813_v30 = vpop.permute.xlu2 %812  ;;  %v882_v31 = vpop.xlane.xlu0 %881  ;;  %vm801_vm12 = vweird.f32 %v1334_v27 }
 0x2eb   : > { %1335 = vrcp.f32 %v882_v31  ;;  %833 = vmatpush.msra.mxu3 %v813_v30  ;;  %v714_v34 = vsel %vm713_vm10, %v1332_v20, %v710_v28  ;;  %vm802_vm14 = vmor %vm800_vm13, %vm801_vm12  ;;  %v894_v49 = vand.u32 2147483648, %v882_v31  ;;  %v892_v51 = vand.u32 2147483647, %v882_v31 }
 0x2ec   : > { %v797_v33 = vsub.f32 1.0, %v796_v29  ;;  %v719_v36 = vsel %vm716_vm11, %v718_v32, %v714_v34  ;;  %vm888_vm3 = vweird.f32 %v882_v31 }
 0x2ed   : > { %v720_v39 = vmul.f32 %v1890_v62, %v719_v36  ;;  %v895_v53 = vor.u32 1.1754944e-38, %v894_v49  ;;  %vm893_vm5 = vcmp.eq.f32.partialorder %v892_v51, 8.507059e+37  ;;  %v936_v62 = vld [vmem:[#allocation11 + $0x18] sm:$0xff] }
 0x2ee   : > { %v798_v37 = vmul.f32 %v1334_v27, %v797_v33  ;;  %956 = vmatpush.msra.mxu2 %v936_v62 }
 0x2ef   : > { %1206 = vst.msk [vmem:[%s1903_s7 + $0x8] sm:$0xff] %vm586_vm1, %v720_v39 }
 0x2f0   : > { %v799_v40 = vadd.f32 %v1334_v27, %v798_v37  ;;  %957 = vmatpush.msra.mxu2 %v935_v63 }
 0x2f1   : > { %v1336_v41 = vpop.eup %1335 }
 0x2f2   : > { %v803_v43 = vsel %vm802_vm14, %v1334_v27, %v799_v40  ;;  %v884_v44 = vmul.f32 %v1336_v41, %v882_v31  ;;  %vm889_vm2 = vweird.f32 %v1336_v41  ;;  %958 = vmatpush.msra.mxu2 %v934_v0 }
 0x2f3   : > { %v808_v45 = vsel %vm805_vm15, %v807_v42, %v803_v43  ;;  %v725_v46 = vpop.permute.xlu1 %724  ;;  %vm890_vm4 = vmor %vm888_vm3, %vm889_vm2 }
 0x2f4   : > { %v885_v47 = vsub.f32 1.0, %v884_v44  ;;  %745 = vmatpush.msrb.mxu1 %v725_v46  ;;  %v809_v48 = vmul.f32 %v1894_v3, %v808_v45  ;;  %959 = vmatpush.msra.mxu2 %v933_v1 }
 0x2f5   : > { %1207 = vmatmul.msk.f32.vlgmr.msrb.gmra.mxu1 %vm586_vm1, %v720_v39 }
 0x2f6   : > { %v886_v50 = vmul.f32 %v1336_v41, %v885_v47  ;;  %1210 = vst.msk [vmem:[%s1903_s7 + $0x10] sm:$0xff] %vm586_vm1, %v809_v48  ;;  %1211 = vmatmul.msk.f32.vlgmr.msra.gmra.mxu3 %vm586_vm1, %v809_v48 }
 0x2f8   : > { %v887_v52 = vadd.f32 %v1336_v41, %v886_v50 }
 0x2fa   : > { %v891_v54 = vsel %vm890_vm4, %v1336_v41, %v887_v52 }
 0x2fb   : > { %v896_v55 = vsel %vm893_vm5, %v895_v53, %v891_v54 }
 0x2fc   : > { %v897_v56 = vmul.f32 %v1898_v9, %v896_v55 }
 0x2fd   : > { %v901_v57 = vpop.permute.xlu0 %900 }
 0x2fe   : > { %921 = vmatpush.msra.mxu1 %v901_v57  ;;  %1214 = vst.msk [vmem:[%s1903_s7 + $0x18] sm:$0xff] %vm586_vm1, %v897_v56 }
 0x2ff   : > { %1215 = vmatmul.msk.f32.vlgmr.msra.gmra.mxu1 %vm586_vm1, %v897_v56 }
 0x301   : > { %v663_v58 = vpop.f32.mrf.mxu3 }
 0x302   : > { %666 = vst.msk [vmem:[#allocation2] sm:$0xff] %vm586_vm1, %v663_v58  ;;  %vm754_vm1 = vcmask 130112  }
 0x372   : > { %v747_v59 = vpop.f32.mrf.mxu1 }
 0x373   : > { %751 = vrot.lane.b32.xlu1 %v747_v59, %s1603_s30 }
 0x379   : > { %v835_v60 = vpop.f32.mrf.mxu3 }
 0x37a   : > { %839 = vrot.lane.b32.xlu0 %v835_v60, %s1604_s17 }
 0x37c   : > { %v923_v61 = vpop.f32.mrf.mxu1 }
 0x37d   : > { %927 = vrot.lane.b32.xlu2 %v923_v61, %s1605_s19 }
 0x3d7   : > { %v928_v4 = vpop.permute.xlu2 %927 }
 0x3e5   : > { %v752_v2 = vpop.permute.xlu1 %751 }
 0x3e6   : > { %755 = vst.msk [vmem:[#allocation2] sm:$0xff] %vm754_vm1, %v752_v2 }
 0x3ec   : > { %v840_v3 = vpop.permute.xlu0 %839 }
 0x3ed   : > { %843 = vst.msk [vmem:[#allocation2] sm:$0xff] %vm842_vm6, %v840_v3 }
 0x3ee   : > { %931 = vst.msk [vmem:[#allocation2] sm:$0xff] %vm930_vm7, %v928_v4 }
 0x3f5   : > { %v932_v5 = vld [vmem:[#allocation2] sm:$0xff] }
 0x3f6   : > { %1216 = vmatmul.msk.f32.vlgmr.msra.gmra.mxu2 %vm492_vm0, %v932_v5 }
 0x3f7   : > { %1514 = shalt.err (!%p1511_p6)
}
 0x3f8   : > { %s1606_s12 = smov 128   ;;  %s1219_s7 = sshll.u32 %s1681_s16, 3 }
 0x3f9   : > { %1240 = dma.vmem_to_hbm [thread:$0]  (%p1726_p0), %s998_s21, 512, %s1000_s4, %s971_s20, %s1606_s12, %s1606_s12, %s1603_s30  }
 0x3fa   : > { %s2028_s8 = sld [smem:[#allocation28_spill]]  ;;  %s472_s24 = scalar_lea.vmem [#allocation12], %s1818_s18 }
 0x3fb   : > { %s2029_s1 = sld [smem:[#allocation27_spill]]  ;;  %s983_s14 = sshll.u32 %s472_s24, 4  ;;  %s984_s14 = int_to_ptr.vmem [resolvable:$true] %s983_s14 }
 0x3fc   : > { %s966_s30 = scalar_lea.sflag [#allocation5], %s1815_s15 }
 0x400   : > { %s981_s28 = scalar_lea.hbm %s2028_s8, %s1219_s7  ;;  %s1535_s18 = scalar_lea.hbm %s2028_s8, 16 }
 0x401   : > { %v1320_v6 = vld [vmem:[%s2029_s1] ss:$0 sm:$0xff]  ;;  %s985_s13 = sshll.u32 %s981_s28, 4  ;;  %s986_s13 = int_to_ptr.hbm [resolvable:$true] %s985_s13 }
 0x402   : > { %s1529_s16 = sshra.s32 %s986_s13, 4  ;;  %s1530_s16 = int_to_ptr.hbm [resolvable:$true] %s1529_s16 }
 0x403   : > { %s1531_s21 = scalar_lea.hbm %s1530_s16, 8  ;;  %p1536_p8 = scmp.lt.s32.totalorder %s1530_s16, %s2028_s8 }
 0x404   : > { %p1532_p11 = scmp.ne.s32.totalorder %s1530_s16, %s1531_s21  ;;  %p1537_p13 = scmp.lt.s32.totalorder %s1535_s18, %s1531_s21 }
 0x406   : > { %p1533_p12 = pnand %p1532_p11, %p1726_p0  ;;  %p1538_p9 = por %p1537_p13, %p1536_p8 }
 0x408   : > { %p1534_p3 = pneg %p1533_p12 }
 0x40a   : > { %p1539_p2 = pnand %p1538_p9, %p1534_p3 }
 0x479   : > { %v961_v7 = vpop.f32.mrf.mxu2 }
 0x47a   : > { %v962_v8 = vadd.f32 %v1320_v6, %v961_v7 }
 0x47c   : > { %964 = vst.msk [vmem:[%s472_s24] sm:$0xff] %vm492_vm0, %v962_v8 }
 0x47d   : > { %1542 = shalt.err (!%p1539_p2)
}
 0x47e   : > { %1239 = dma.vmem_to_hbm [thread:$0]  (%p1726_p0), %s984_s14, 128, %s986_s13, %s966_s30  }
 0x47f PF: > { %s2030_s15 = sld [smem:[#allocation20_spill]] }
 0x480   : > { %s2032_s12 = sld [smem:[#allocation21_spill]] }
 0x485   : > { %s1014_s7 = sand.u32 1, %s2030_s15  }
 0x486   : > { %p2033_p4 = scmp.ge.s32.totalorder %s2032_s12, 2  ;;  %s1015_s17 = scalar_lea.sflag [#allocation5], %s1014_s7 }
 0x488   : > { %p1261_p1 = pnand %p2033_p4, %p1732_p5 }
 0x48a   : > { %p1262_p7 = pneg %p1261_p1 }
 0x48c   : > { %1572 = dma.done.wait (%p1262_p7), %s1015_s17, 128  }
 0x48d   : > { %1574 = vsyncadd (%p1262_p7), %s1015_s17, 4294967168  ;;  %s1025_s19 = scalar_lea.sflag [#allocation14], %s1014_s7 }
 0x48e   : > { %1576 = dma.done.wait (%p1262_p7), %s1025_s19, 512  }
 0x48f   : > { %1578 = vsyncadd (%p1262_p7), %s1025_s19, 4294966784  ;;  %s2034_s12 = sld [smem:[#allocation22_spill]]  ;;  %s2036_s30 = smov %s1585_s10 }
 0x490   : > { %s2035_s29 = sld [smem:[#allocation23_spill]]  ;;  %s2037_s10 = smov %s1589_s11 }
 0x495   : > { %p30_p0 = scmp.ge.s32.totalorder %s2034_s12, 4  }
 0x496   : > { %s2038_s11 = smov %s2035_s29 }
 0x497   :  { %32 = sbr.rel (!%p30_p0) target bundleno = 15 (0xf), region = 156 }
 0x49c   :  { %1031 = vsyncpa [#allocation4], 1 }
 0x49d   :  { %1033 = vsyncpa [#allocation4 + $0x1], 1 }
 0x49e   :  { %1034 = vsyncpa [#allocation7], 1 }
 0x49f   :  { %1036 = vsyncpa [#allocation7 + $0x1], 1 }
 0x4a0   :  { %1037 = vsyncpa [#allocation10], 1 }
 0x4a1   :  { %1038 = vsyncpa [#allocation5], 1 }
 0x4a2   :  { %1040 = vsyncpa [#allocation5 + $0x1], 1 }
 0x4a3   :  { %1041 = vsyncpa [#allocation14], 1 }
 0x4a4   :  { %1043 = vsyncpa [#allocation14 + $0x1], 1 }

</bundles_post_ra>
